<compile_context>
chip_gen: v7x
topology: tpu7x:2x2x1
jax: 0.10.0
libtpu: 0.0.40
codegen_flags: <defaults>
</compile_context>

<pallas_src>
import functools

import jax
import jax.numpy as jnp
from jax.experimental import pallas as pl
from jax.experimental.pallas import tpu as pltpu

MULTIPLIER = 1.0


def hypernet_kernel(x_ref, w1_ref, b1_ref, w2_ref, b2_ref, o_ref):
    # Two MXU matmuls (bf16 in, f32 acc) + VPU epilogue (bias, ReLU, residual).
    x = x_ref[...]                                   # f32 (tm, dim)
    h = jnp.dot(x.astype(jnp.bfloat16), w1_ref[...],
                preferred_element_type=jnp.float32)
    h = jnp.maximum(h + b1_ref[...], 0.0)            # bias + ReLU in f32
    y = jnp.dot(h.astype(jnp.bfloat16), w2_ref[...],
                preferred_element_type=jnp.float32)
    y = y + b2_ref[...]
    o_ref[...] = (x + y * MULTIPLIER).astype(o_ref.dtype)


@functools.partial(jax.jit, static_argnames=("tm",))
def hypernetwork_forward(x2d, w1, b1, w2, b2, *, tm=256):
    """x2d: (N, dim) f32. w1: (dim, hidden) bf16, b1: (1, hidden) f32,
    w2: (hidden, dim) bf16, b2: (1, dim) f32."""
    n, dim = x2d.shape
    hidden = w1.shape[1]

    # Pad rows to a multiple of tm so every grid step is a full, unmasked tile.
    n_pad = (-n) % tm
    if n_pad:
        x2d = jnp.pad(x2d, ((0, n_pad), (0, 0)))
    n_padded = n + n_pad
    grid = (n_padded // tm,)

    resident = dict(pipeline_mode=pl.Buffered(1))    # block-invariant operands

    out = pl.pallas_call(
        hypernet_kernel,
        out_shape=jax.ShapeDtypeStruct((n_padded, dim), x2d.dtype),
        grid_spec=pltpu.PrefetchScalarGridSpec(
            num_scalar_prefetch=0,
            grid=grid,
            in_specs=[
                pl.BlockSpec((tm, dim), lambda i: (i, 0)),                  # x tile (streamed)
                pl.BlockSpec((dim, hidden), lambda i: (0, 0), **resident),  # W1 resident, bf16
                pl.BlockSpec((1, hidden), lambda i: (0, 0), **resident),    # b1
                pl.BlockSpec((hidden, dim), lambda i: (0, 0), **resident),  # W2 resident, bf16
                pl.BlockSpec((1, dim), lambda i: (0, 0), **resident),       # b2
            ],
            out_specs=pl.BlockSpec((tm, dim), lambda i: (i, 0)),
        ),
        compiler_params=pltpu.CompilerParams(
            dimension_semantics=("parallel",),       # shard row axis across v7x's 2 TCs
            vmem_limit_bytes=48 * 1024 * 1024,       # > v5e 16 MiB default, < v7x 64 MiB physical
        ),
    )(x2d, w1, b1, w2, b2)

    # TODO(synk): for dim large enough that W1/W2 can't stay VMEM-resident
    # (~>1.4k on v7x), add a hidden/K reduction grid axis with a VMEM
    # accumulator instead of fully-resident weights.
    if n_pad:
        out = out[:n]
    return out


def init_params(key, dim, layer_structure=(1, 2, 1)):
    """Deterministic 'Normal' init: weights ~ N(0, 0.01), biases ~ N(0, 0.005).
    Weights pre-transposed to (in, out); weights stored bf16 for the MXU."""
    params = []
    for i in range(len(layer_structure) - 1):
        fan_in = int(dim * layer_structure[i])
        fan_out = int(dim * layer_structure[i + 1])
        key, kw, kb = jax.random.split(key, 3)
        w = 0.01 * jax.random.normal(kw, (fan_in, fan_out), jnp.float32)
        b = 0.005 * jax.random.normal(kb, (1, fan_out), jnp.float32)
        params.append((w, b))
    return params


def reference_forward(x2d, w1_f32, b1, w2_f32, b2):
    h = jnp.maximum(x2d @ w1_f32 + b1, 0.0)
    y = h @ w2_f32 + b2
    return x2d + y * MULTIPLIER


if __name__ == "__main__":
    # Tokens of width `dim`; N = batch*seq = 1024 rows -> grid of 4 full tiles.
    batch, seq, dim = 2, 512, 128   # hidden = 2 * dim = 256
    key = jax.random.PRNGKey(0)
    kx, kp = jax.random.split(key)

    x = jax.random.normal(kx, (batch, seq, dim), jnp.float32)
    (w1, b1), (w2, b2) = init_params(kp, dim, layer_structure=(1, 2, 1))
    w1_bf16 = w1.astype(jnp.bfloat16)
    w2_bf16 = w2.astype(jnp.bfloat16)

    x2d = x.reshape(batch * seq, dim)
    out2d = hypernetwork_forward(x2d, w1_bf16, b1, w2_bf16, b2, tm=256)
    out = out2d.reshape(batch, seq, dim)
    jax.block_until_ready(out)

    ref = reference_forward(x2d, w1, b1, w2, b2).reshape(batch, seq, dim)
    # bf16 matmul inputs (f32 accumulate) -> slightly looser tolerance than pure f32.
    assert jnp.allclose(out, ref, atol=1e-2, rtol=1e-2), "mismatch vs reference"

    # TODO(synk): dropout (train-mode only) and optional LayerNorm branch not
    # exercised in this config; add_layer_norm=False, use_dropout=False.
    print("KERNEL_OK")
</pallas_src>

<mosaic_0001>
module attributes {stable_mosaic.version = 11 : i64} {
  func.func @hypernet_kernel(%arg0: i32, %arg1: memref<256x128xf32, #tpu.memory_space<vmem>>, %arg2: memref<128x256xbf16, #tpu.memory_space<vmem>>, %arg3: memref<1x256xf32, #tpu.memory_space<vmem>>, %arg4: memref<256x128xbf16, #tpu.memory_space<vmem>>, %arg5: memref<1x128xf32, #tpu.memory_space<vmem>>, %arg6: memref<256x128xf32, #tpu.memory_space<vmem>>) attributes {dimension_semantics = [#tpu.dimension_semantics<parallel>], iteration_bounds = array<i64: 4>, scalar_prefetch = 0 : i64, scratch_operands = 0 : i64, tpu.core_type = #tpu.core_type<tc>, window_params = [{transform_indices = @transform_0, window_bounds = array<i64: 256, 128>}, {pipeline_mode = #tpu.pipeline_mode<synchronous>, transform_indices = @transform_1, window_bounds = array<i64: 128, 256>}, {pipeline_mode = #tpu.pipeline_mode<synchronous>, transform_indices = @transform_2, window_bounds = array<i64: 1, 256>}, {pipeline_mode = #tpu.pipeline_mode<synchronous>, transform_indices = @transform_3, window_bounds = array<i64: 256, 128>}, {pipeline_mode = #tpu.pipeline_mode<synchronous>, transform_indices = @transform_4, window_bounds = array<i64: 1, 128>}, {transform_indices = @transform_5, window_bounds = array<i64: 256, 128>}]} {
    %c0 = arith.constant 0 : index
    %c0_0 = arith.constant 0 : index
    %0 = vector.load %arg1[%c0, %c0_0] : memref<256x128xf32, #tpu.memory_space<vmem>>, vector<256x128xf32>
    %1 = arith.truncf %0 : vector<256x128xf32> to vector<256x128xbf16>
    %c0_1 = arith.constant 0 : index
    %c0_2 = arith.constant 0 : index
    %2 = vector.load %arg2[%c0_1, %c0_2] : memref<128x256xbf16, #tpu.memory_space<vmem>>, vector<128x256xbf16>
    %cst = arith.constant dense<0.000000e+00> : vector<256x256xf32>
    %3 = tpu.matmul %1, %2, %cst {dimension_numbers = #tpu.dot_dimension_numbers<[1], [0], [0], [1], [0, 0, 1, 1], [], []>} : vector<256x128xbf16>, vector<128x256xbf16>, vector<256x256xf32> -> vector<256x256xf32>
    %c0_3 = arith.constant 0 : index
    %c0_4 = arith.constant 0 : index
    %4 = vector.load %arg3[%c0_3, %c0_4] : memref<1x256xf32, #tpu.memory_space<vmem>>, vector<1x256xf32>
    %5 = vector.broadcast %4 : vector<1x256xf32> to vector<256x256xf32>
    %6 = arith.addf %3, %5 : vector<256x256xf32>
    %cst_5 = arith.constant 0.000000e+00 : f32
    %7 = vector.broadcast %cst_5 : f32 to vector<256x256xf32>
    %8 = arith.maximumf %6, %7 : vector<256x256xf32>
    %9 = arith.truncf %8 : vector<256x256xf32> to vector<256x256xbf16>
    %c0_6 = arith.constant 0 : index
    %c0_7 = arith.constant 0 : index
    %10 = vector.load %arg4[%c0_6, %c0_7] : memref<256x128xbf16, #tpu.memory_space<vmem>>, vector<256x128xbf16>
    %cst_8 = arith.constant dense<0.000000e+00> : vector<256x128xf32>
    %11 = tpu.matmul %9, %10, %cst_8 {dimension_numbers = #tpu.dot_dimension_numbers<[1], [0], [0], [1], [0, 0, 1, 1], [], []>} : vector<256x256xbf16>, vector<256x128xbf16>, vector<256x128xf32> -> vector<256x128xf32>
    %c0_9 = arith.constant 0 : index
    %c0_10 = arith.constant 0 : index
    %12 = vector.load %arg5[%c0_9, %c0_10] : memref<1x128xf32, #tpu.memory_space<vmem>>, vector<1x128xf32>
    %13 = vector.broadcast %12 : vector<1x128xf32> to vector<256x128xf32>
    %14 = arith.addf %11, %13 : vector<256x128xf32>
    %cst_11 = arith.constant 1.000000e+00 : f32
    %15 = vector.broadcast %cst_11 : f32 to vector<256x128xf32>
    %16 = arith.mulf %14, %15 : vector<256x128xf32>
    %17 = arith.addf %0, %16 : vector<256x128xf32>
    %c0_12 = arith.constant 0 : index
    %c0_13 = arith.constant 0 : index
    %18 = vector.load %arg6[%c0_12, %c0_13] : memref<256x128xf32, #tpu.memory_space<vmem>>, vector<256x128xf32>
    tpu.vector_store %arg6[%c0_12, %c0_13], %17 {strides = array<i32>} : memref<256x128xf32, #tpu.memory_space<vmem>>, vector<256x128xf32>,
    return
  }
  func.func @transform_0(%arg0: i32) -> (i32, i32) {
    %c0_i32 = arith.constant 0 : i32
    %c0_i32_0 = arith.constant 0 : i32
    return %arg0, %c0_i32 : i32, i32
  }
  func.func @transform_1(%arg0: i32) -> (i32, i32) {
    %c0_i32 = arith.constant 0 : i32
    %c0_i32_0 = arith.constant 0 : i32
    %c0_i32_1 = arith.constant 0 : i32
    return %c0_i32, %c0_i32_0 : i32, i32
  }
  func.func @transform_2(%arg0: i32) -> (i32, i32) {
    %c0_i32 = arith.constant 0 : i32
    %c0_i32_0 = arith.constant 0 : i32
    %c0_i32_1 = arith.constant 0 : i32
    return %c0_i32, %c0_i32_0 : i32, i32
  }
  func.func @transform_3(%arg0: i32) -> (i32, i32) {
    %c0_i32 = arith.constant 0 : i32
    %c0_i32_0 = arith.constant 0 : i32
    %c0_i32_1 = arith.constant 0 : i32
    return %c0_i32, %c0_i32_0 : i32, i32
  }
  func.func @transform_4(%arg0: i32) -> (i32, i32) {
    %c0_i32 = arith.constant 0 : i32
    %c0_i32_0 = arith.constant 0 : i32
    %c0_i32_1 = arith.constant 0 : i32
    return %c0_i32, %c0_i32_0 : i32, i32
  }
  func.func @transform_5(%arg0: i32) -> (i32, i32) {
    %c0_i32 = arith.constant 0 : i32
    %c0_i32_0 = arith.constant 0 : i32
    return %arg0, %c0_i32 : i32, i32
  }
}

</mosaic_0001>

<bundles_post_ra>
// kernel: hypernetwork_forward.1
= control target key start
LH: loop header
LB: loop body
LE: loop exit
PB: predicated region body
PF: predicated region fallthrough
CT: control target
= control target key end

     0   :  { %10 = vsyncpa [#allocation3], 0  ;;  %s2220_s0 = inlined_call_operand.hbm [shape: f32[1024,128], index: 0, kind: input, shape index: {}]   ;;  %s2221_s1 = inlined_call_operand.hbm [shape: bf16[128,256], index: 1, kind: input, shape index: {}]   ;;  %s2222_s2 = inlined_call_operand.vmem [shape: f32[1,256], index: 2, kind: input, shape index: {}]   ;;  %s2223_s3 = inlined_call_operand.hbm [shape: bf16[256,128], index: 3, kind: input, shape index: {}]   ;;  %s2224_s4 = inlined_call_operand.vmem [shape: f32[1,128], index: 4, kind: input, shape index: {}]   ;;  %s2225_s5 = inlined_call_operand.hbm [shape: f32[1024,128], index: 5, kind: output, shape index: {}]  }
   0x1   :  { %12 = vsyncpa [#allocation3 + $0x1], 0 }
   0x2   :  { %13 = vsyncpa [#allocation6], 0 }
   0x3   :  { %14 = vsyncpa [#allocation4], 0 }
   0x4   :  { %16 = vsyncpa [#allocation4 + $0x1], 0  ;;  %s1664_s18 = smov 0   ;;  %s1666_s19 = smov 0  }
   0x5   :  { %s1668_s20 = smov 0   ;;  %s1670_s21 = smov 0  }
   0x6 LB: > { %s1685_s22 = sadd.s32 4294967295, %s1621_s21   ;;  %s1186_s23 = sadd.s32 4294967294, %s1621_s21   ;;  %s1621_s21 = sphi %s1670_s21, %s2244_s21   ;;  %s1617_s20 = sphi %s1668_s20, %s2243_s20   ;;  %s1613_s19 = sphi %s1666_s19, %s2242_s19   ;;  %s1609_s18 = sphi %s1664_s18, %s2241_s18  }
   0x7   : > { %p42_p0 = scmp.ne.s32.totalorder %s1613_s19, %s1609_s18  ;;  %p2226_p1 = scmp.eq.s32.totalorder %s1685_s22, 0 }
   0x8   : > { %p156_p3 = scmp.eq.s32.totalorder %s1186_s23, 3  ;;  %p1187_p5 = scmp.ge.s32.totalorder %s1621_s21, 1 }
   0x9   : > { %p1694_p4 = por %p2226_p1, %p42_p0  ;;  %p163_p7 = scmp.lt.s32.totalorder %s1621_s21, 5 }
   0xa   : > { %p1699_p6 = por %p156_p3, %p42_p0  ;;  %s1623_s27 = smov [#allocation5]  }
   0xb   : > { %s2229_s24 = scalar_select %p1694_p4, 1, 0 }
   0xc   : > { %s2230_s25 = scalar_select %p1699_p6, 1, 0 }
   0xd   : > { %p1704_p8 = pnand %p1187_p5, %p163_p7  ;;  %s175_s28 = sshll.u32 %s1623_s27, 4  ;;  %s176_s28 = int_to_ptr.vmem [resolvable:$true] %s175_s28 }
   0xe   : > { %s1624_s30 = smov [#allocation7]   ;;  %s1465_s9 = scalar_lea.hbm %s2221_s1, 2048 }
   0xf   : > { %s2231_s26 = scalar_select %p1704_p8, 1, 0 }
  0x10   : > { %p1363_p9 = pneg %p1704_p8  ;;  %s191_s6 = sshll.u32 %s1624_s30, 4  ;;  %s1716_s6 = int_to_ptr.vmem [resolvable:$true] %s191_s6 }
  0x11   : > { %p1466_p11 = scmp.ne.s32.totalorder %s2221_s1, %s1465_s9  ;;  %p1472_p3 = scmp.lt.u32.totalorder %s1465_s9, %s2221_s1 }
  0x12   : > { %p1712_p10 = pnand %p1363_p9, %p2226_p1 }
  0x14   : > { %p1467_p12 = pneg %p1712_p10 }
  0x16   : > { %p1468_p13 = pnand %p1467_p12, %p1466_p11 }
  0x18   : > { %p1469_p0 = pneg %p1468_p13 }
  0x1a   : > { %p1474_p5 = pnand %p1472_p3, %p1469_p0 }
  0x1c   : > { %1477 = shalt.err (!%p1474_p5)
}
  0x1d   : > { %s1478_s14 = scalar_lea.vmem %s176_s28, 2048  ;;  %p1486_p2 = scmp.lt.s32.totalorder %s176_s28, %s176_s28 }
  0x1e   : > { %p1479_p7 = scmp.ne.s32.totalorder %s176_s28, %s1478_s14  ;;  %p1487_p6 = scmp.lt.s32.totalorder %s1478_s14, %s1478_s14 }
  0x20   : > { %p1481_p9 = pnand %p1479_p7, %p1467_p12  ;;  %p1488_p4 = por %p1487_p6, %p1486_p2 }
  0x22   : > { %p1482_p1 = pneg %p1481_p9 }
  0x24   : > { %p1489_p8 = pnand %p1488_p4, %p1482_p1 }
  0x26   : > { %1492 = shalt.err (!%p1489_p8)
}
  0x27   : > { %s1625_s15 = smov 128   ;;  %s1626_s16 = smov 8  }
  0x28   : > { %1366 = dma.hbm_to_vmem [thread:$0]  (!%p1712_p10), %s2221_s1, 2048, %s176_s28, [#allocation6], %s1625_s15, %s1625_s15, %s1626_s16  }
  0x29   : > { %s1493_s7 = scalar_lea.hbm %s2223_s3, 2048 }
  0x2a   : > { %p1494_p1 = scmp.ne.s32.totalorder %s2223_s3, %s1493_s7  ;;  %p1500_p6 = scmp.lt.u32.totalorder %s1493_s7, %s2223_s3 }
  0x2c   : > { %p1496_p2 = pnand %p1494_p1, %p1467_p12 }
  0x2e   : > { %p1497_p4 = pneg %p1496_p2 }
  0x30   : > { %p1502_p8 = pnand %p1500_p6, %p1497_p4 }
  0x32   : > { %1505 = shalt.err (!%p1502_p8)
}
  0x33   : > { %s1506_s28 = scalar_lea.vmem %s1716_s6, 2048  ;;  %p1514_p3 = scmp.lt.s32.totalorder %s1716_s6, %s1716_s6 }
  0x34   : > { %p1507_p11 = scmp.ne.s32.totalorder %s1716_s6, %s1506_s28  ;;  %p1515_p5 = scmp.lt.s32.totalorder %s1506_s28, %s1506_s28 }
  0x36   : > { %p1509_p13 = pnand %p1507_p11, %p1467_p12  ;;  %p1516_p7 = por %p1515_p5, %p1514_p3 }
  0x38   : > { %p1510_p0 = pneg %p1509_p13 }
  0x3a   : > { %p1517_p9 = pnand %p1516_p7, %p1510_p0 }
  0x3c   : > { %1520 = shalt.err (!%p1517_p9)
}
  0x3d   : > { %s1627_s12 = smov 64   ;;  %s1628_s13 = smov 4  }
  0x3e   : > { %1369 = dma.hbm_to_vmem [thread:$0]  (!%p1712_p10), %s2223_s3, 2048, %s1716_s6, [#allocation6], %s1627_s12, %s1627_s12, %s1628_s13  }
  0x3f   : > { %s1769_s23 = sadd.s32 1, %s1621_s21   ;;  %s29_s30 = sadd.s32 1, %s1617_s20 }
  0x40   : > { %s26_s27 = ssub.s32 %s1621_s21, %s1769_s23  ;;  %p36_p1 = scmp.ne.s32.totalorder %s1617_s20, %s1613_s19 }
  0x41   : > { %p27_p12 = scmp.eq.s32.totalorder %s26_s27, 0  ;;  %p37_p2 = scmp.eq.s32.totalorder %s1621_s21, 0 }
  0x42   : > { %p2233_p6 = scmp.eq.s32.totalorder %s1685_s22, 3  ;;  %p1380_p11 = scmp.lt.s32.totalorder %s1621_s21, 4 }
  0x43   : > { %s1778_s7 = scalar_select %p27_p12, %s1617_s20, %s29_s30  }
  0x44   : > { %p38_p4 = por %p37_p2, %p36_p1  ;;  %p1782_p8 = por %p2233_p6, %p36_p1 }
  0x45   : > { %s208_s29 = sand.u32 1, %s1617_s20   ;;  %s1237_s6 = sshll.u32 %s1621_s21, 12 }
  0x46   : > { %s1191_s9 = sshll.u32 %s208_s29, 8  ;;  %s1792_s28 = scalar_lea.hbm %s2220_s0, %s1237_s6 }
  0x47   : > { %s212_s12 = scalar_lea.vmem [#allocation2], %s1191_s9  ;;  %p1796_p10 = pnand %p1380_p11, %p38_p4 }
  0x48   : > { %s219_s13 = sshll.u32 %s212_s12, 4  ;;  %s1800_s17 = scalar_lea.sflag [#allocation3], %s208_s29  ;;  %s1794_s13 = int_to_ptr.vmem [resolvable:$true] %s219_s13 }
  0x49   : > { %s1521_s27 = scalar_lea.hbm %s1792_s28, 4096  ;;  %p1523_p0 = pneg %p1796_p10 }
  0x4a   : > { %p1522_p13 = scmp.ne.s32.totalorder %s1792_s28, %s1521_s27  ;;  %s1526_s6 = scalar_lea.hbm %s2220_s0, 16384 }
  0x4b   : > { %p1527_p7 = scmp.lt.u32.totalorder %s1792_s28, %s2220_s0  ;;  %p1528_p9 = scmp.lt.u32.totalorder %s1526_s6, %s1521_s27 }
  0x4c   : > { %p1524_p3 = pnand %p1523_p0, %p1522_p13  ;;  %p1530_p1 = scmp.lt.u32.totalorder %s1521_s27, %s1792_s28 }
  0x4d   : > { %p1529_p12 = por %p1528_p9, %p1527_p7 }
  0x4e   : > { %p1525_p5 = pneg %p1524_p3 }
  0x4f   : > { %p1531_p2 = por %p1530_p1, %p1529_p12 }
  0x51   : > { %p1532_p4 = pnand %p1531_p2, %p1525_p5 }
  0x53   : > { %1535 = shalt.err (!%p1532_p4)
}
  0x54   : > { %s1536_s29 = scalar_lea.vmem %s1794_s13, 4096  ;;  %s1629_s12 = smov [#allocation2]  }
  0x55   : > { %p1537_p6 = scmp.ne.s32.totalorder %s1794_s13, %s1536_s29  ;;  %s1541_s30 = sshll.u32 %s1629_s12, 4  ;;  %s1542_s30 = int_to_ptr.vmem [resolvable:$false] %s1541_s30 }
  0x56   : > { %s1543_s9 = scalar_lea.vmem %s1542_s30, 8192  ;;  %p1544_p3 = scmp.lt.s32.totalorder %s1794_s13, %s1542_s30 }
  0x57   : > { %p1539_p11 = pnand %p1537_p6, %p1523_p0  ;;  %p1545_p7 = scmp.lt.s32.totalorder %s1543_s9, %s1536_s29 }
  0x59   : > { %p1540_p13 = pneg %p1539_p11  ;;  %p1546_p9 = por %p1545_p7, %p1544_p3 }
  0x5b   : > { %p1547_p12 = pnand %p1546_p9, %p1540_p13 }
  0x5d   : > { %1550 = shalt.err (!%p1547_p12)
}
  0x5e   : > { %1373 = dma.hbm_to_vmem [thread:$0]  (!%p1796_p10), %s1792_s28, 4096, %s1794_s13, %s1800_s17, %s1625_s15, %s1625_s15, %s1626_s16  }
  0x5f   : > { %p2236_p0 = scmp.ne.s32.totalorder %s2231_s26, 0 }
  0x60   : > { %s1834_s27 = sand.u32 (!%p2236_p0), 1, %s1613_s19   ;;  %p2237_p5 = scmp.ne.s32.totalorder (!%p2236_p0), %s2229_s24, 0 }
  0x61   : > { %231 = sbr.rel (%p2236_p0) target bundleno = 719 (0x2cf), region = 40  ;;  %s1195_s6 = sshll.u32 (!%p2236_p0), %s1834_s27, 8 }
  0x62   : > { %s234_s10 = scalar_lea.sflag (!%p2236_p0), [#allocation3], %s1834_s27  ;;  %s1840_s14 = scalar_lea.vmem (!%p2236_p0), [#allocation2], %s1195_s6 }
  0x68   : > { %1596 = dma.done.wait (%p2237_p5), %s234_s10, 4096  }
  0x69   : > { %1598 = vsyncadd (%p2237_p5), %s234_s10, 4294963200  ;;  %p2238_p10 = scmp.eq.s32.totalorder %s1685_s22, 0 }
  0x6b   : > { %1600 = dma.done.wait (%p2238_p10), [#allocation6], 4096   ;;  %p2239_p1 = pmov %p2238_p10 }
  0x6c   : > { %v1630_v0 = vmov 0   ;;  %v1425_v1 = vld [vmem:[#allocation5 + $0x4] ss:$8 sps:$4 sm:$0xff]   ;;  %v1427_v2 = vld [vmem:[#allocation5] ss:$8 sps:$4 sm:$0xff]   ;;  %v1453_v24 = vld [vmem:[#allocation7 + $0x50] sm:$0xff]  }
  0x6d   : > { %1602 = vsyncadd (%p2239_p1), [#allocation6], 4294963200  ;;  %463 = vmatprep.mubr.bf16.mxu0 %v1630_v0  ;;  %431 = vmatprep.subr.bf16.mxu0 %v1425_v1  ;;  %v1428_v3 = vld [vmem:[#allocation5 + $0x14] ss:$8 sps:$4 sm:$0xff]   ;;  %v1430_v4 = vld [vmem:[#allocation5 + $0x10] ss:$8 sps:$4 sm:$0xff]  }
  0x6e   : > { %432 = vmatpush1.bf16.msra.mxu0 %v1427_v2  ;;  %v1431_v5 = vld [vmem:[#allocation5 + $0x24] ss:$8 sps:$4 sm:$0xff]   ;;  %v1433_v6 = vld [vmem:[#allocation5 + $0x20] ss:$8 sps:$4 sm:$0xff]   ;;  %v1434_v7 = vld [vmem:[#allocation5 + $0x34] ss:$8 sps:$4 sm:$0xff]  }
  0x6f   : > { %433 = vmatprep.subr.bf16.mxu0 %v1428_v3  ;;  %v1436_v8 = vld [vmem:[#allocation5 + $0x30] ss:$8 sps:$4 sm:$0xff]   ;;  %v1437_v9 = vld [vmem:[#allocation5 + $0x44] ss:$8 sps:$4 sm:$0xff]   ;;  %v1439_v10 = vld [vmem:[#allocation5 + $0x40] ss:$8 sps:$4 sm:$0xff]  }
  0x70   : > { %v1440_v11 = vld [vmem:[#allocation5 + $0x54] ss:$8 sps:$4 sm:$0xff]   ;;  %v1442_v12 = vld [vmem:[#allocation5 + $0x50] ss:$8 sps:$4 sm:$0xff]   ;;  %v1443_v13 = vld [vmem:[#allocation5 + $0x64] ss:$8 sps:$4 sm:$0xff]  }
  0x71   : > { %v1445_v14 = vld [vmem:[#allocation5 + $0x60] ss:$8 sps:$4 sm:$0xff]   ;;  %v1446_v15 = vld [vmem:[#allocation5 + $0x74] ss:$8 sps:$4 sm:$0xff]   ;;  %v1448_v19 = vld [vmem:[#allocation5 + $0x70] ss:$8 sps:$4 sm:$0xff]  }
  0x72   : > { %434 = vmatpush1.bf16.msra.mxu0 %v1430_v4  ;;  %v1449_v16 = vld [vmem:[#allocation7 + $0x40] sm:$0xff]   ;;  %v1451_v18 = vld [vmem:[#allocation7 + $0x48] sm:$0xff]   ;;  %v1454_v25 = vld [vmem:[#allocation7 + $0x10] sm:$0xff]   ;;  %s2075_s28 = scalar_lea.vmem [#allocation8], %s1195_s6  ;;  %s1238_s13 = sshll.u32 %s1685_s22, 12 }
  0x73   : > { %435 = vmatprep.subr.bf16.mxu0 %v1431_v5  ;;  %v1450_v17 = vld [vmem:[#allocation7] sm:$0xff]   ;;  %v1855_v21 = vld [vmem:[%s1840_s14 + $0x8] sm:$0xff]  ;;  %1239 = vmatprep.subr.bf16.mxu1 %v1449_v16  ;;  %v1455_v26 = vld [vmem:[#allocation7 + $0x58] sm:$0xff]   ;;  %s1094_s17 = sshll.u32 %s2075_s28, 4  ;;  %s2172_s12 = scalar_lea.hbm %s2225_s5, %s1238_s13  ;;  %s2174_s17 = int_to_ptr.vmem [resolvable:$true] %s1094_s17 }
  0x74   : > { %v1852_v20 = vld [vmem:[%s1840_s14] sm:$0xff]  ;;  %1240 = vmatpush3.bf16.msra.mxu1 %v1450_v17  ;;  %v1452_v22 = vld [vmem:[#allocation7 + $0x8] sm:$0xff]   ;;  %v1860_v27 = vld [vmem:[%s1840_s14 + $0x10] sm:$0xff]  ;;  %s1081_s22 = scalar_lea.sflag [#allocation4], %s1834_s27  ;;  %s1551_s30 = scalar_lea.vmem %s2174_s17, 4096 }
  0x75   : > { %v307_v23 = vpack.c.bf16 %v1855_v21, %v1852_v20  ;;  %1241 = vmatprep.subr.bf16.mxu1 %v1451_v18  ;;  %v1863_v28 = vld [vmem:[%s1840_s14 + $0x18] sm:$0xff]  ;;  %v1457_v31 = vld [vmem:[#allocation7 + $0x60] sm:$0xff]   ;;  %v1459_v33 = vld [vmem:[#allocation7 + $0x68] sm:$0xff]   ;;  %v341_v18 = vlaneseq  ;;  %p1552_p2 = scmp.ne.s32.totalorder %s2174_s17, %s1551_s30  ;;  %s1631_s9 = smov [#allocation8]  }
  0x76   : > { %436 = vmatpush1.bf16.msra.mxu0 %v1433_v6  ;;  %v1456_v29 = vld [vmem:[#allocation7 + $0x18] sm:$0xff]   ;;  %v308_v30 = vpack.c.bf16 %v1863_v28, %v1860_v27  ;;  %v1458_v32 = vld [vmem:[#allocation7 + $0x20] sm:$0xff]   ;;  %v1873_v35 = vld [vmem:[%s1840_s14 + $0x28] sm:$0xff]  ;;  %s1555_s6 = sshll.u32 %s1631_s9, 4  ;;  %s1556_s6 = int_to_ptr.vmem [resolvable:$false] %s1555_s6 }
  0x77   : > { %437 = vmatprep.subr.bf16.mxu0 %v1434_v7  ;;  %v1870_v34 = vld [vmem:[%s1840_s14 + $0x20] sm:$0xff]  ;;  %v1879_v37 = vld [vmem:[%s1840_s14 + $0x30] sm:$0xff]  ;;  %v1882_v38 = vld [vmem:[%s1840_s14 + $0x38] sm:$0xff]  ;;  %p1553_p4 = pnand %p1552_p2, %p1782_p8  ;;  %s1557_s10 = scalar_lea.vmem %s1556_s6, 8192 }
  0x78   : > { %1242 = vmatpush3.bf16.msra.mxu1 %v1452_v22  ;;  %v309_v36 = vpack.c.bf16 %v1873_v35, %v1870_v34  ;;  %v310_v39 = vpack.c.bf16 %v1882_v38, %v1879_v37  ;;  %v1888_v40 = vld [vmem:[%s1840_s14 + $0x40] sm:$0xff]  ;;  %v1891_v41 = vld [vmem:[%s1840_s14 + $0x48] sm:$0xff]  ;;  %v1897_v43 = vld [vmem:[%s1840_s14 + $0x50] sm:$0xff]  ;;  %p1558_p11 = scmp.lt.s32.totalorder %s2174_s17, %s1556_s6  ;;  %p1559_p13 = scmp.lt.s32.totalorder %s1557_s10, %s1551_s30 }
  0x79   : > { %1243 = vmatprep.subr.bf16.mxu1 %v1453_v24  ;;  %v311_v42 = vpack.c.bf16 %v1891_v41, %v1888_v40  ;;  %v1900_v44 = vld [vmem:[%s1840_s14 + $0x58] sm:$0xff]  ;;  %v1906_v46 = vld [vmem:[%s1840_s14 + $0x60] sm:$0xff]  ;;  %v1909_v47 = vld [vmem:[%s1840_s14 + $0x68] sm:$0xff]  ;;  %p1554_p6 = pneg %p1553_p4 }
  0x7a   : > { %438 = vmatpush1.bf16.msra.mxu0 %v1436_v8  ;;  %v312_v45 = vpack.c.bf16 %v1900_v44, %v1897_v43  ;;  %v313_v48 = vpack.c.bf16 %v1909_v47, %v1906_v46  ;;  %v1915_v49 = vld [vmem:[%s1840_s14 + $0x70] sm:$0xff]  ;;  %v1918_v50 = vld [vmem:[%s1840_s14 + $0x78] sm:$0xff]  ;;  %v1924_v52 = vld [vmem:[%s1840_s14 + $0x80] sm:$0xff]  ;;  %p1560_p3 = por %p1559_p13, %p1558_p11 }
  0x7b   : > { %439 = vmatprep.subr.bf16.mxu0 %v1437_v9  ;;  %v314_v51 = vpack.c.bf16 %v1918_v50, %v1915_v49  ;;  %v1927_v53 = vld [vmem:[%s1840_s14 + $0x88] sm:$0xff]  ;;  %v1933_v55 = vld [vmem:[%s1840_s14 + $0x90] sm:$0xff]  ;;  %v1936_v56 = vld [vmem:[%s1840_s14 + $0x98] sm:$0xff] }
  0x7c   : > { %1244 = vmatpush3.bf16.msra.mxu1 %v1454_v25  ;;  %v315_v54 = vpack.c.bf16 %v1927_v53, %v1924_v52  ;;  %v316_v57 = vpack.c.bf16 %v1936_v56, %v1933_v55  ;;  %v1942_v58 = vld [vmem:[%s1840_s14 + $0xa0] sm:$0xff]  ;;  %v1945_v59 = vld [vmem:[%s1840_s14 + $0xa8] sm:$0xff]  ;;  %v1951_v61 = vld [vmem:[%s1840_s14 + $0xb0] sm:$0xff]  ;;  %p1561_p7 = pnand %p1560_p3, %p1554_p6 }
  0x7d   : > { %1245 = vmatprep.subr.bf16.mxu1 %v1455_v26  ;;  %v317_v60 = vpack.c.bf16 %v1945_v59, %v1942_v58  ;;  %v1954_v62 = vld [vmem:[%s1840_s14 + $0xb8] sm:$0xff]  ;;  %v1460_v63 = vld [vmem:[#allocation7 + $0x28] sm:$0xff]   ;;  %v1461_v2 = vld [vmem:[#allocation7 + $0x70] sm:$0xff]  }
  0x7e   : > { %440 = vmatpush1.bf16.msra.mxu0 %v1439_v10  ;;  %v318_v1 = vpack.c.bf16 %v1954_v62, %v1951_v61  ;;  %v1462_v3 = vld [vmem:[#allocation7 + $0x30] sm:$0xff]   ;;  %v1463_v4 = vld [vmem:[#allocation7 + $0x78] sm:$0xff]   ;;  %v1960_v5 = vld [vmem:[%s1840_s14 + $0xc0] sm:$0xff] }
  0x7f   : > { %441 = vmatprep.subr.bf16.mxu0 %v1440_v11  ;;  %v1963_v6 = vld [vmem:[%s1840_s14 + $0xc8] sm:$0xff]  ;;  %v1464_v7 = vld [vmem:[#allocation7 + $0x38] sm:$0xff]   ;;  %v1969_v9 = vld [vmem:[%s1840_s14 + $0xd0] sm:$0xff] }
  0x80   : > { %1246 = vmatpush3.bf16.msra.mxu1 %v1456_v29  ;;  %v319_v8 = vpack.c.bf16 %v1963_v6, %v1960_v5  ;;  %v1972_v10 = vld [vmem:[%s1840_s14 + $0xd8] sm:$0xff] }
  0x81   : > { %1247 = vmatprep.subr.bf16.mxu1 %v1457_v31  ;;  %v320_v11 = vpack.c.bf16 %v1972_v10, %v1969_v9  ;;  %v1990_v16 = vld [vmem:[%s1840_s14 + $0xf8] sm:$0xff] }
  0x82   : > { %442 = vmatpush1.bf16.msra.mxu0 %v1442_v12  ;;  %v1978_v12 = vld [vmem:[%s1840_s14 + $0xe0] sm:$0xff] }
  0x83   : > { %443 = vmatprep.subr.bf16.mxu0 %v1443_v13  ;;  %v1981_v13 = vld [vmem:[%s1840_s14 + $0xe8] sm:$0xff] }
  0x84   : > { %1248 = vmatpush3.bf16.msra.mxu1 %v1458_v32 }
  0x85   : > { %1249 = vmatprep.subr.bf16.mxu1 %v1459_v33 }
  0x86   : > { %444 = vmatpush1.bf16.msra.mxu0 %v1445_v14  ;;  %v321_v14 = vpack.c.bf16 %v1981_v13, %v1978_v12 }
  0x87   : > { %445 = vmatprep.subr.bf16.mxu0 %v1446_v15  ;;  %v1987_v15 = vld [vmem:[%s1840_s14 + $0xf0] sm:$0xff] }
  0x88   : > { %1250 = vmatpush3.bf16.msra.mxu1 %v1460_v63  ;;  %v322_v17 = vpack.c.bf16 %v1990_v16, %v1987_v15 }
  0x89   : > { %1251 = vmatprep.subr.bf16.mxu1 %v1461_v2 }
  0x8a   : > { %446 = vmatpush1.bf16.msra.mxu0 %v1448_v19  ;;  %v342_v19 = vshrl.u32 %v341_v18, 7 }
  0x8c   : > { %1252 = vmatpush3.bf16.msra.mxu1 %v1462_v3  ;;  %v343_v22 = vsub.s32 0, %v342_v19  ;;  %v347_v24 = vsub.s32 1, %v342_v19 }
  0x8d   : > { %464 = vmatmul.mubr.bf16.vlgmr.msra.gmra.mrb[0].mxu0 %v307_v23  ;;  %1253 = vmatprep.subr.bf16.mxu1 %v1463_v4  ;;  %v339_v23 = vld [vmem:[%s2222_s2] sm:$0x3] }
  0x8e   : > { %473 = vmatprep.mubr.bf16.mxu0 %v1630_v0  ;;  %v1997_v25 = vrot.slane %v339_v23, %v343_v22  ;;  %v1999_v26 = vrot.slane %v339_v23, %v347_v24 }
  0x90   : > { %1254 = vmatpush3.bf16.msra.mxu1 %v1464_v7 }
  0x95   : > { %474 = vmatmul.mubr.bf16.gmra.mrb[4].mxu0 %v308_v30 }
  0x96   : > { %483 = vmatprep.mubr.bf16.mxu0 %v1630_v0 }
  0x9d   : > { %484 = vmatmul.mubr.bf16.gmra.mrb[8].mxu0 %v309_v36 }
  0x9e   : > { %493 = vmatprep.mubr.bf16.mxu0 %v1630_v0 }
  0xa5   : > { %494 = vmatmul.mubr.bf16.gmra.mrb[12].mxu0 %v310_v39 }
  0xa6   : > { %503 = vmatprep.mubr.bf16.mxu0 %v1630_v0 }
  0xad   : > { %504 = vmatmul.mubr.bf16.gmra.mrb[16].mxu0 %v311_v42 }
  0xae   : > { %513 = vmatprep.mubr.bf16.mxu0 %v1630_v0 }
  0xb5   : > { %514 = vmatmul.mubr.bf16.gmra.mrb[20].mxu0 %v312_v45 }
  0xb6   : > { %523 = vmatprep.mubr.bf16.mxu0 %v1630_v0 }
  0xbd   : > { %524 = vmatmul.mubr.bf16.gmra.mrb[24].mxu0 %v313_v48 }
  0xbe   : > { %533 = vmatprep.mubr.bf16.mxu0 %v1630_v0 }
  0xc5   : > { %534 = vmatmul.mubr.bf16.gmra.mrb[28].mxu0 %v314_v51 }
  0xc6   : > { %543 = vmatprep.mubr.bf16.mxu0 %v1630_v0 }
  0xcd   : > { %544 = vmatmul.mubr.bf16.gmra.mrb[32].mxu0 %v315_v54 }
  0xce   : > { %553 = vmatprep.mubr.bf16.mxu0 %v1630_v0 }
  0xd5   : > { %554 = vmatmul.mubr.bf16.gmra.mrb[36].mxu0 %v316_v57 }
  0xd6   : > { %563 = vmatprep.mubr.bf16.mxu0 %v1630_v0 }
  0xdd   : > { %564 = vmatmul.mubr.bf16.gmra.mrb[40].mxu0 %v317_v60 }
  0xde   : > { %573 = vmatprep.mubr.bf16.mxu0 %v1630_v0 }
  0xe5   : > { %574 = vmatmul.mubr.bf16.gmra.mrb[44].mxu0 %v318_v1 }
  0xe6   : > { %583 = vmatprep.mubr.bf16.mxu0 %v1630_v0 }
  0xed   : > { %584 = vmatmul.mubr.bf16.gmra.mrb[48].mxu0 %v319_v8 }
  0xee   : > { %593 = vmatprep.mubr.bf16.mxu0 %v1630_v0 }
  0xf5   : > { %594 = vmatmul.mubr.bf16.gmra.mrb[52].mxu0 %v320_v11 }
  0xf6   : > { %603 = vmatprep.mubr.bf16.mxu0 %v1630_v0 }
  0xfd   : > { %604 = vmatmul.mubr.bf16.gmra.mrb[56].mxu0 %v321_v14 }
  0xfe   : > { %613 = vmatprep.mubr.bf16.mxu0 %v1630_v0 }
 0x105   : > { %614 = vmatmul.mubr.bf16.gmra.mrb[60].mxu0 %v322_v17 }
 0x160   : > { %v465_v0 = vpop.f32.mrb[0].mxu0 }
 0x161   : > { %v466_v29 = vadd.f32 %v465_v0, %v1997_v25  ;;  %v467_v30 = vpop.f32.mrb[1].mxu0 }
 0x162   : > { %v468_v31 = vadd.f32 %v467_v30, %v1999_v26  ;;  %v469_v32 = vpop.f32.mrb[2].mxu0 }
 0x163   : > { %v470_v33 = vadd.f32 %v469_v32, %v1997_v25  ;;  %v471_v36 = vpop.f32.mrb[3].mxu0  ;;  %v624_v42 = vmax.f32 %v466_v29, 0.0 }
 0x164   : > { %v472_v39 = vadd.f32 %v471_v36, %v1999_v26  ;;  %v625_v48 = vmax.f32 %v468_v31, 0.0 }
 0x165   : > { %v626_v45 = vmax.f32 %v470_v33, 0.0 }
 0x166   : > { %v627_v51 = vmax.f32 %v472_v39, 0.0 }
 0x167   : > { %v688_v54 = vpack.c.bf16 %v626_v45, %v624_v42 }
 0x168   : > { %v475_v57 = vpop.f32.mrb[4].mxu0  ;;  %v689_v60 = vpack.c.bf16 %v627_v51, %v625_v48 }
 0x169   : > { %v476_v63 = vadd.f32 %v475_v57, %v1997_v25  ;;  %v477_v1 = vpop.f32.mrb[5].mxu0 }
 0x16a   : > { %v478_v2 = vadd.f32 %v477_v1, %v1999_v26  ;;  %v479_v3 = vpop.f32.mrb[6].mxu0  ;;  %887 = vmatprep.mubr.bf16.mxu1 %v689_v60 }
 0x16b   : > { %v480_v4 = vadd.f32 %v479_v3, %v1997_v25  ;;  %v481_v7 = vpop.f32.mrb[7].mxu0  ;;  %888 = vmatmul.mubr.bf16.vlgmr.msra.gmra.mrb[0].mxu1 %v688_v54  ;;  %v628_v11 = vmax.f32 %v476_v63, 0.0 }
 0x16c   : > { %v482_v8 = vadd.f32 %v481_v7, %v1999_v26  ;;  %v629_v17 = vmax.f32 %v478_v2, 0.0 }
 0x16d   : > { %v630_v14 = vmax.f32 %v480_v4, 0.0 }
 0x16e   : > { %v631_v18 = vmax.f32 %v482_v8, 0.0 }
 0x16f   : > { %v690_v19 = vpack.c.bf16 %v630_v14, %v628_v11 }
 0x170   : > { %v691_v22 = vpack.c.bf16 %v631_v18, %v629_v17  ;;  %v485_v23 = vpop.f32.mrb[8].mxu0 }
 0x171   : > { %v486_v24 = vadd.f32 %v485_v23, %v1997_v25  ;;  %v487_v0 = vpop.f32.mrb[9].mxu0 }
 0x172   : > { %v488_v29 = vadd.f32 %v487_v0, %v1999_v26  ;;  %v489_v30 = vpop.f32.mrb[10].mxu0  ;;  %895 = vmatprep.mubr.bf16.mxu1 %v691_v22 }
 0x173   : > { %v490_v31 = vadd.f32 %v489_v30, %v1997_v25  ;;  %v491_v32 = vpop.f32.mrb[11].mxu0  ;;  %896 = vmatmul.mubr.bf16.gmra.mrb[4].mxu1 %v690_v19  ;;  %v632_v36 = vmax.f32 %v486_v24, 0.0 }
 0x174   : > { %v492_v33 = vadd.f32 %v491_v32, %v1999_v26  ;;  %v633_v42 = vmax.f32 %v488_v29, 0.0 }
 0x175   : > { %v634_v39 = vmax.f32 %v490_v31, 0.0 }
 0x176   : > { %v635_v45 = vmax.f32 %v492_v33, 0.0 }
 0x177   : > { %v692_v48 = vpack.c.bf16 %v634_v39, %v632_v36 }
 0x178   : > { %v693_v51 = vpack.c.bf16 %v635_v45, %v633_v42  ;;  %v495_v54 = vpop.f32.mrb[12].mxu0 }
 0x179   : > { %v496_v57 = vadd.f32 %v495_v54, %v1997_v25  ;;  %v497_v60 = vpop.f32.mrb[13].mxu0 }
 0x17a   : > { %v498_v63 = vadd.f32 %v497_v60, %v1999_v26  ;;  %v499_v1 = vpop.f32.mrb[14].mxu0  ;;  %903 = vmatprep.mubr.bf16.mxu1 %v693_v51 }
 0x17b   : > { %v500_v2 = vadd.f32 %v499_v1, %v1997_v25  ;;  %v501_v3 = vpop.f32.mrb[15].mxu0  ;;  %904 = vmatmul.mubr.bf16.gmra.mrb[8].mxu1 %v692_v48  ;;  %v636_v7 = vmax.f32 %v496_v57, 0.0 }
 0x17c   : > { %v502_v4 = vadd.f32 %v501_v3, %v1999_v26  ;;  %v637_v11 = vmax.f32 %v498_v63, 0.0 }
 0x17d   : > { %v638_v8 = vmax.f32 %v500_v2, 0.0 }
 0x17e   : > { %v639_v14 = vmax.f32 %v502_v4, 0.0 }
 0x17f   : > { %v694_v17 = vpack.c.bf16 %v638_v8, %v636_v7 }
 0x180   : > { %v695_v18 = vpack.c.bf16 %v639_v14, %v637_v11  ;;  %v505_v19 = vpop.f32.mrb[16].mxu0 }
 0x181   : > { %v506_v22 = vadd.f32 %v505_v19, %v1997_v25  ;;  %v507_v23 = vpop.f32.mrb[17].mxu0 }
 0x182   : > { %v508_v24 = vadd.f32 %v507_v23, %v1999_v26  ;;  %v509_v0 = vpop.f32.mrb[18].mxu0  ;;  %911 = vmatprep.mubr.bf16.mxu1 %v695_v18 }
 0x183   : > { %v510_v29 = vadd.f32 %v509_v0, %v1997_v25  ;;  %v511_v30 = vpop.f32.mrb[19].mxu0  ;;  %912 = vmatmul.mubr.bf16.gmra.mrb[12].mxu1 %v694_v17  ;;  %v640_v32 = vmax.f32 %v506_v22, 0.0 }
 0x184   : > { %v512_v31 = vadd.f32 %v511_v30, %v1999_v26  ;;  %v641_v36 = vmax.f32 %v508_v24, 0.0 }
 0x185   : > { %v642_v33 = vmax.f32 %v510_v29, 0.0 }
 0x186   : > { %v643_v39 = vmax.f32 %v512_v31, 0.0 }
 0x187   : > { %v696_v42 = vpack.c.bf16 %v642_v33, %v640_v32 }
 0x188   : > { %v697_v45 = vpack.c.bf16 %v643_v39, %v641_v36  ;;  %v515_v48 = vpop.f32.mrb[20].mxu0 }
 0x189   : > { %v516_v51 = vadd.f32 %v515_v48, %v1997_v25  ;;  %v517_v54 = vpop.f32.mrb[21].mxu0 }
 0x18a   : > { %v518_v57 = vadd.f32 %v517_v54, %v1999_v26  ;;  %v519_v60 = vpop.f32.mrb[22].mxu0  ;;  %919 = vmatprep.mubr.bf16.mxu1 %v697_v45 }
 0x18b   : > { %v520_v63 = vadd.f32 %v519_v60, %v1997_v25  ;;  %v521_v1 = vpop.f32.mrb[23].mxu0  ;;  %920 = vmatmul.mubr.bf16.gmra.mrb[16].mxu1 %v696_v42  ;;  %v644_v3 = vmax.f32 %v516_v51, 0.0 }
 0x18c   : > { %v522_v2 = vadd.f32 %v521_v1, %v1999_v26  ;;  %v645_v7 = vmax.f32 %v518_v57, 0.0 }
 0x18d   : > { %v646_v4 = vmax.f32 %v520_v63, 0.0 }
 0x18e   : > { %v647_v8 = vmax.f32 %v522_v2, 0.0 }
 0x18f   : > { %v698_v11 = vpack.c.bf16 %v646_v4, %v644_v3 }
 0x190   : > { %v699_v14 = vpack.c.bf16 %v647_v8, %v645_v7  ;;  %v525_v17 = vpop.f32.mrb[24].mxu0 }
 0x191   : > { %v526_v18 = vadd.f32 %v525_v17, %v1997_v25  ;;  %v527_v19 = vpop.f32.mrb[25].mxu0 }
 0x192   : > { %v528_v22 = vadd.f32 %v527_v19, %v1999_v26  ;;  %v529_v23 = vpop.f32.mrb[26].mxu0  ;;  %927 = vmatprep.mubr.bf16.mxu1 %v699_v14 }
 0x193   : > { %v530_v24 = vadd.f32 %v529_v23, %v1997_v25  ;;  %v531_v0 = vpop.f32.mrb[27].mxu0  ;;  %928 = vmatmul.mubr.bf16.gmra.mrb[20].mxu1 %v698_v11  ;;  %v648_v30 = vmax.f32 %v526_v18, 0.0 }
 0x194   : > { %v532_v29 = vadd.f32 %v531_v0, %v1999_v26  ;;  %v649_v32 = vmax.f32 %v528_v22, 0.0 }
 0x195   : > { %v650_v31 = vmax.f32 %v530_v24, 0.0 }
 0x196   : > { %v651_v33 = vmax.f32 %v532_v29, 0.0 }
 0x197   : > { %v700_v36 = vpack.c.bf16 %v650_v31, %v648_v30 }
 0x198   : > { %v701_v39 = vpack.c.bf16 %v651_v33, %v649_v32  ;;  %v535_v42 = vpop.f32.mrb[28].mxu0 }
 0x199   : > { %v536_v45 = vadd.f32 %v535_v42, %v1997_v25  ;;  %v537_v48 = vpop.f32.mrb[29].mxu0 }
 0x19a   : > { %v538_v51 = vadd.f32 %v537_v48, %v1999_v26  ;;  %v539_v54 = vpop.f32.mrb[30].mxu0  ;;  %935 = vmatprep.mubr.bf16.mxu1 %v701_v39 }
 0x19b   : > { %v540_v57 = vadd.f32 %v539_v54, %v1997_v25  ;;  %v541_v60 = vpop.f32.mrb[31].mxu0  ;;  %936 = vmatmul.mubr.bf16.gmra.mrb[24].mxu1 %v700_v36  ;;  %v652_v1 = vmax.f32 %v536_v45, 0.0 }
 0x19c   : > { %v542_v63 = vadd.f32 %v541_v60, %v1999_v26  ;;  %v653_v3 = vmax.f32 %v538_v51, 0.0 }
 0x19d   : > { %v654_v2 = vmax.f32 %v540_v57, 0.0 }
 0x19e   : > { %v655_v4 = vmax.f32 %v542_v63, 0.0 }
 0x19f   : > { %v702_v7 = vpack.c.bf16 %v654_v2, %v652_v1 }
 0x1a0   : > { %v703_v8 = vpack.c.bf16 %v655_v4, %v653_v3  ;;  %v545_v11 = vpop.f32.mrb[32].mxu0 }
 0x1a1   : > { %v546_v14 = vadd.f32 %v545_v11, %v1997_v25  ;;  %v547_v17 = vpop.f32.mrb[33].mxu0 }
 0x1a2   : > { %v548_v18 = vadd.f32 %v547_v17, %v1999_v26  ;;  %v549_v19 = vpop.f32.mrb[34].mxu0  ;;  %943 = vmatprep.mubr.bf16.mxu1 %v703_v8 }
 0x1a3   : > { %v550_v22 = vadd.f32 %v549_v19, %v1997_v25  ;;  %v551_v23 = vpop.f32.mrb[35].mxu0  ;;  %944 = vmatmul.mubr.bf16.gmra.mrb[28].mxu1 %v702_v7  ;;  %v656_v0 = vmax.f32 %v546_v14, 0.0 }
 0x1a4   : > { %v552_v24 = vadd.f32 %v551_v23, %v1999_v26  ;;  %v657_v30 = vmax.f32 %v548_v18, 0.0 }
 0x1a5   : > { %v658_v29 = vmax.f32 %v550_v22, 0.0 }
 0x1a6   : > { %v659_v31 = vmax.f32 %v552_v24, 0.0 }
 0x1a7   : > { %v704_v32 = vpack.c.bf16 %v658_v29, %v656_v0 }
 0x1a8   : > { %v705_v33 = vpack.c.bf16 %v659_v31, %v657_v30  ;;  %v555_v36 = vpop.f32.mrb[36].mxu0 }
 0x1a9   : > { %v556_v39 = vadd.f32 %v555_v36, %v1997_v25  ;;  %v557_v42 = vpop.f32.mrb[37].mxu0 }
 0x1aa   : > { %v558_v45 = vadd.f32 %v557_v42, %v1999_v26  ;;  %v559_v48 = vpop.f32.mrb[38].mxu0  ;;  %951 = vmatprep.mubr.bf16.mxu1 %v705_v33 }
 0x1ab   : > { %v560_v51 = vadd.f32 %v559_v48, %v1997_v25  ;;  %v561_v54 = vpop.f32.mrb[39].mxu0  ;;  %952 = vmatmul.mubr.bf16.gmra.mrb[32].mxu1 %v704_v32  ;;  %v660_v60 = vmax.f32 %v556_v39, 0.0 }
 0x1ac   : > { %v562_v57 = vadd.f32 %v561_v54, %v1999_v26  ;;  %v661_v1 = vmax.f32 %v558_v45, 0.0 }
 0x1ad   : > { %v662_v63 = vmax.f32 %v560_v51, 0.0 }
 0x1ae   : > { %v663_v2 = vmax.f32 %v562_v57, 0.0 }
 0x1af   : > { %v706_v3 = vpack.c.bf16 %v662_v63, %v660_v60 }
 0x1b0   : > { %v707_v4 = vpack.c.bf16 %v663_v2, %v661_v1  ;;  %v565_v7 = vpop.f32.mrb[40].mxu0 }
 0x1b1   : > { %v566_v8 = vadd.f32 %v565_v7, %v1997_v25  ;;  %v567_v11 = vpop.f32.mrb[41].mxu0 }
 0x1b2   : > { %v568_v14 = vadd.f32 %v567_v11, %v1999_v26  ;;  %v569_v17 = vpop.f32.mrb[42].mxu0  ;;  %959 = vmatprep.mubr.bf16.mxu1 %v707_v4 }
 0x1b3   : > { %v570_v18 = vadd.f32 %v569_v17, %v1997_v25  ;;  %v571_v19 = vpop.f32.mrb[43].mxu0  ;;  %960 = vmatmul.mubr.bf16.gmra.mrb[36].mxu1 %v706_v3  ;;  %v664_v23 = vmax.f32 %v566_v8, 0.0 }
 0x1b4   : > { %v572_v22 = vadd.f32 %v571_v19, %v1999_v26  ;;  %v665_v0 = vmax.f32 %v568_v14, 0.0 }
 0x1b5   : > { %v666_v24 = vmax.f32 %v570_v18, 0.0 }
 0x1b6   : > { %v667_v29 = vmax.f32 %v572_v22, 0.0 }
 0x1b7   : > { %v708_v30 = vpack.c.bf16 %v666_v24, %v664_v23 }
 0x1b8   : > { %v709_v31 = vpack.c.bf16 %v667_v29, %v665_v0  ;;  %v575_v32 = vpop.f32.mrb[44].mxu0 }
 0x1b9   : > { %v576_v33 = vadd.f32 %v575_v32, %v1997_v25  ;;  %v577_v36 = vpop.f32.mrb[45].mxu0 }
 0x1ba   : > { %v578_v39 = vadd.f32 %v577_v36, %v1999_v26  ;;  %v579_v42 = vpop.f32.mrb[46].mxu0  ;;  %967 = vmatprep.mubr.bf16.mxu1 %v709_v31 }
 0x1bb   : > { %v580_v45 = vadd.f32 %v579_v42, %v1997_v25  ;;  %v581_v48 = vpop.f32.mrb[47].mxu0  ;;  %968 = vmatmul.mubr.bf16.gmra.mrb[40].mxu1 %v708_v30  ;;  %v668_v54 = vmax.f32 %v576_v33, 0.0 }
 0x1bc   : > { %v582_v51 = vadd.f32 %v581_v48, %v1999_v26  ;;  %v669_v60 = vmax.f32 %v578_v39, 0.0 }
 0x1bd   : > { %v670_v57 = vmax.f32 %v580_v45, 0.0 }
 0x1be   : > { %v671_v63 = vmax.f32 %v582_v51, 0.0 }
 0x1bf   : > { %v710_v1 = vpack.c.bf16 %v670_v57, %v668_v54 }
 0x1c0   : > { %v711_v2 = vpack.c.bf16 %v671_v63, %v669_v60  ;;  %v585_v3 = vpop.f32.mrb[48].mxu0 }
 0x1c1   : > { %v586_v4 = vadd.f32 %v585_v3, %v1997_v25  ;;  %v587_v7 = vpop.f32.mrb[49].mxu0 }
 0x1c2   : > { %v588_v8 = vadd.f32 %v587_v7, %v1999_v26  ;;  %v589_v11 = vpop.f32.mrb[50].mxu0  ;;  %975 = vmatprep.mubr.bf16.mxu1 %v711_v2 }
 0x1c3   : > { %v590_v14 = vadd.f32 %v589_v11, %v1997_v25  ;;  %v591_v17 = vpop.f32.mrb[51].mxu0  ;;  %976 = vmatmul.mubr.bf16.gmra.mrb[44].mxu1 %v710_v1  ;;  %v672_v19 = vmax.f32 %v586_v4, 0.0 }
 0x1c4   : > { %v592_v18 = vadd.f32 %v591_v17, %v1999_v26  ;;  %v673_v23 = vmax.f32 %v588_v8, 0.0 }
 0x1c5   : > { %v674_v22 = vmax.f32 %v590_v14, 0.0 }
 0x1c6   : > { %v675_v24 = vmax.f32 %v592_v18, 0.0 }
 0x1c7   : > { %v712_v0 = vpack.c.bf16 %v674_v22, %v672_v19 }
 0x1c8   : > { %v713_v29 = vpack.c.bf16 %v675_v24, %v673_v23  ;;  %v595_v30 = vpop.f32.mrb[52].mxu0 }
 0x1c9   : > { %v596_v31 = vadd.f32 %v595_v30, %v1997_v25  ;;  %v597_v32 = vpop.f32.mrb[53].mxu0 }
 0x1ca   : > { %v598_v33 = vadd.f32 %v597_v32, %v1999_v26  ;;  %v599_v36 = vpop.f32.mrb[54].mxu0  ;;  %983 = vmatprep.mubr.bf16.mxu1 %v713_v29 }
 0x1cb   : > { %v600_v39 = vadd.f32 %v599_v36, %v1997_v25  ;;  %v601_v42 = vpop.f32.mrb[55].mxu0  ;;  %984 = vmatmul.mubr.bf16.gmra.mrb[48].mxu1 %v712_v0  ;;  %v676_v48 = vmax.f32 %v596_v31, 0.0 }
 0x1cc   : > { %v602_v45 = vadd.f32 %v601_v42, %v1999_v26  ;;  %v677_v54 = vmax.f32 %v598_v33, 0.0 }
 0x1cd   : > { %v678_v51 = vmax.f32 %v600_v39, 0.0 }
 0x1ce   : > { %v679_v57 = vmax.f32 %v602_v45, 0.0 }
 0x1cf   : > { %v714_v60 = vpack.c.bf16 %v678_v51, %v676_v48 }
 0x1d0   : > { %v715_v63 = vpack.c.bf16 %v679_v57, %v677_v54  ;;  %v605_v1 = vpop.f32.mrb[56].mxu0 }
 0x1d1   : > { %v606_v2 = vadd.f32 %v605_v1, %v1997_v25  ;;  %v607_v3 = vpop.f32.mrb[57].mxu0 }
 0x1d2   : > { %v608_v4 = vadd.f32 %v607_v3, %v1999_v26  ;;  %v609_v7 = vpop.f32.mrb[58].mxu0  ;;  %991 = vmatprep.mubr.bf16.mxu1 %v715_v63  ;;  %v2068_v63 = vld [vmem:[%s2224_s4] ss:$0 sm:$0xff] }
 0x1d3   : > { %v610_v8 = vadd.f32 %v609_v7, %v1997_v25  ;;  %v611_v11 = vpop.f32.mrb[59].mxu0  ;;  %992 = vmatmul.mubr.bf16.gmra.mrb[52].mxu1 %v714_v60  ;;  %v680_v17 = vmax.f32 %v606_v2, 0.0 }
 0x1d4   : > { %v612_v14 = vadd.f32 %v611_v11, %v1999_v26  ;;  %v681_v19 = vmax.f32 %v608_v4, 0.0 }
 0x1d5   : > { %v682_v18 = vmax.f32 %v610_v8, 0.0 }
 0x1d6   : > { %v683_v22 = vmax.f32 %v612_v14, 0.0 }
 0x1d7   : > { %v716_v23 = vpack.c.bf16 %v682_v18, %v680_v17 }
 0x1d8   : > { %v717_v24 = vpack.c.bf16 %v683_v22, %v681_v19  ;;  %v615_v0 = vpop.f32.mrb[60].mxu0 }
 0x1d9   : > { %v616_v29 = vadd.f32 %v615_v0, %v1997_v25  ;;  %v617_v30 = vpop.f32.mrb[61].mxu0 }
 0x1da   : > { %v618_v31 = vadd.f32 %v617_v30, %v1999_v26  ;;  %v619_v32 = vpop.f32.mrb[62].mxu0  ;;  %999 = vmatprep.mubr.bf16.mxu1 %v717_v24 }
 0x1db   : > { %v620_v33 = vadd.f32 %v619_v32, %v1997_v25  ;;  %v621_v36 = vpop.f32.mrb[63].mxu0  ;;  %1000 = vmatmul.mubr.bf16.gmra.mrb[56].mxu1 %v716_v23  ;;  %v684_v42 = vmax.f32 %v616_v29, 0.0 }
 0x1dc   : > { %v622_v39 = vadd.f32 %v621_v36, %v1999_v26  ;;  %v685_v48 = vmax.f32 %v618_v31, 0.0 }
 0x1dd   : > { %v686_v45 = vmax.f32 %v620_v33, 0.0 }
 0x1de   : > { %v687_v51 = vmax.f32 %v622_v39, 0.0 }
 0x1df   : > { %v718_v54 = vpack.c.bf16 %v686_v45, %v684_v42 }
 0x1e0   : > { %v719_v57 = vpack.c.bf16 %v687_v51, %v685_v48 }
 0x1e2   : > { %1007 = vmatprep.mubr.bf16.mxu1 %v719_v57 }
 0x1e3   : > { %1008 = vmatmul.mubr.bf16.gmra.mrb[60].mxu1 %v718_v54 }
 0x23e   : > { %v1255_v60 = vpop.f32.mrb[0].mxu1 }
 0x23f   : > { %v1256_v25 = vpop.f32.mrb[1].mxu1 }
 0x240   : > { %v1257_v1 = vadd.f32 %v1256_v25, %v1255_v60  ;;  %v1258_v2 = vpop.f32.mrb[2].mxu1 }
 0x241   : > { %v1259_v3 = vpop.f32.mrb[3].mxu1 }
 0x242   : > { %v890_v26 = vadd.f32 %v1257_v1, %v2068_v63  ;;  %v1260_v4 = vadd.f32 %v1259_v3, %v1258_v2 }
 0x244   : > { %v1016_v7 = vadd.f32 %v890_v26, %v1852_v20  ;;  %v893_v8 = vadd.f32 %v1260_v4, %v2068_v63 }
 0x246   : > { %1048 = vst [vmem:[%s2075_s28] sm:$0xff] %v1016_v7  ;;  %v1017_v11 = vadd.f32 %v893_v8, %v1855_v21  ;;  %v1261_v14 = vpop.f32.mrb[4].mxu1 }
 0x247   : > { %v1262_v17 = vpop.f32.mrb[5].mxu1 }
 0x248   : > { %1049 = vst [vmem:[%s2075_s28 + $0x8] sm:$0xff] %v1017_v11  ;;  %v1263_v18 = vadd.f32 %v1262_v17, %v1261_v14  ;;  %v1264_v19 = vpop.f32.mrb[6].mxu1 }
 0x249   : > { %v1265_v22 = vpop.f32.mrb[7].mxu1 }
 0x24a   : > { %v898_v20 = vadd.f32 %v1263_v18, %v2068_v63  ;;  %v1266_v23 = vadd.f32 %v1265_v22, %v1264_v19 }
 0x24c   : > { %v1018_v24 = vadd.f32 %v898_v20, %v1860_v27  ;;  %v901_v0 = vadd.f32 %v1266_v23, %v2068_v63 }
 0x24e   : > { %1050 = vst [vmem:[%s2075_s28 + $0x10] sm:$0xff] %v1018_v24  ;;  %v1019_v29 = vadd.f32 %v901_v0, %v1863_v28  ;;  %v1267_v30 = vpop.f32.mrb[8].mxu1 }
 0x24f   : > { %v1268_v21 = vpop.f32.mrb[9].mxu1 }
 0x250   : > { %1051 = vst [vmem:[%s2075_s28 + $0x18] sm:$0xff] %v1019_v29  ;;  %v1269_v31 = vadd.f32 %v1268_v21, %v1267_v30  ;;  %v1270_v32 = vpop.f32.mrb[10].mxu1 }
 0x251   : > { %v1271_v33 = vpop.f32.mrb[11].mxu1 }
 0x252   : > { %v906_v36 = vadd.f32 %v1269_v31, %v2068_v63  ;;  %v1272_v39 = vadd.f32 %v1271_v33, %v1270_v32 }
 0x254   : > { %v1020_v42 = vadd.f32 %v906_v36, %v1870_v34  ;;  %v909_v27 = vadd.f32 %v1272_v39, %v2068_v63 }
 0x256   : > { %1052 = vst [vmem:[%s2075_s28 + $0x20] sm:$0xff] %v1020_v42  ;;  %v1021_v45 = vadd.f32 %v909_v27, %v1873_v35  ;;  %v1273_v48 = vpop.f32.mrb[12].mxu1 }
 0x257   : > { %v1274_v28 = vpop.f32.mrb[13].mxu1 }
 0x258   : > { %1053 = vst [vmem:[%s2075_s28 + $0x28] sm:$0xff] %v1021_v45  ;;  %v1275_v51 = vadd.f32 %v1274_v28, %v1273_v48  ;;  %v1276_v54 = vpop.f32.mrb[14].mxu1 }
 0x259   : > { %v1277_v57 = vpop.f32.mrb[15].mxu1 }
 0x25a   : > { %v914_v60 = vadd.f32 %v1275_v51, %v2068_v63  ;;  %v1278_v25 = vadd.f32 %v1277_v57, %v1276_v54 }
 0x25c   : > { %v1022_v1 = vadd.f32 %v914_v60, %v1879_v37  ;;  %v917_v34 = vadd.f32 %v1278_v25, %v2068_v63 }
 0x25e   : > { %1054 = vst [vmem:[%s2075_s28 + $0x30] sm:$0xff] %v1022_v1  ;;  %v1023_v2 = vadd.f32 %v917_v34, %v1882_v38  ;;  %v1279_v3 = vpop.f32.mrb[16].mxu1 }
 0x25f   : > { %v1280_v35 = vpop.f32.mrb[17].mxu1 }
 0x260   : > { %1055 = vst [vmem:[%s2075_s28 + $0x38] sm:$0xff] %v1023_v2  ;;  %v1281_v26 = vadd.f32 %v1280_v35, %v1279_v3  ;;  %v1282_v4 = vpop.f32.mrb[18].mxu1 }
 0x261   : > { %v1283_v7 = vpop.f32.mrb[19].mxu1 }
 0x262   : > { %v922_v8 = vadd.f32 %v1281_v26, %v2068_v63  ;;  %v1284_v11 = vadd.f32 %v1283_v7, %v1282_v4 }
 0x264   : > { %v1024_v14 = vadd.f32 %v922_v8, %v1888_v40  ;;  %v925_v37 = vadd.f32 %v1284_v11, %v2068_v63 }
 0x266   : > { %1056 = vst [vmem:[%s2075_s28 + $0x40] sm:$0xff] %v1024_v14  ;;  %v1025_v17 = vadd.f32 %v925_v37, %v1891_v41  ;;  %v1285_v18 = vpop.f32.mrb[20].mxu1 }
 0x267   : > { %v1286_v38 = vpop.f32.mrb[21].mxu1 }
 0x268   : > { %1057 = vst [vmem:[%s2075_s28 + $0x48] sm:$0xff] %v1025_v17  ;;  %v1287_v19 = vadd.f32 %v1286_v38, %v1285_v18  ;;  %v1288_v22 = vpop.f32.mrb[22].mxu1 }
 0x269   : > { %v1289_v20 = vpop.f32.mrb[23].mxu1 }
 0x26a   : > { %v930_v23 = vadd.f32 %v1287_v19, %v2068_v63  ;;  %v1290_v24 = vadd.f32 %v1289_v20, %v1288_v22 }
 0x26c   : > { %v1026_v0 = vadd.f32 %v930_v23, %v1897_v43  ;;  %v933_v40 = vadd.f32 %v1290_v24, %v2068_v63 }
 0x26e   : > { %1058 = vst [vmem:[%s2075_s28 + $0x50] sm:$0xff] %v1026_v0  ;;  %v1027_v29 = vadd.f32 %v933_v40, %v1900_v44  ;;  %v1291_v30 = vpop.f32.mrb[24].mxu1 }
 0x26f   : > { %v1292_v41 = vpop.f32.mrb[25].mxu1 }
 0x270   : > { %1059 = vst [vmem:[%s2075_s28 + $0x58] sm:$0xff] %v1027_v29  ;;  %v1293_v21 = vadd.f32 %v1292_v41, %v1291_v30  ;;  %v1294_v31 = vpop.f32.mrb[26].mxu1 }
 0x271   : > { %v1295_v32 = vpop.f32.mrb[27].mxu1 }
 0x272   : > { %v938_v33 = vadd.f32 %v1293_v21, %v2068_v63  ;;  %v1296_v36 = vadd.f32 %v1295_v32, %v1294_v31 }
 0x274   : > { %v1028_v39 = vadd.f32 %v938_v33, %v1906_v46  ;;  %v941_v43 = vadd.f32 %v1296_v36, %v2068_v63 }
 0x276   : > { %1060 = vst [vmem:[%s2075_s28 + $0x60] sm:$0xff] %v1028_v39  ;;  %v1029_v42 = vadd.f32 %v941_v43, %v1909_v47  ;;  %v1297_v27 = vpop.f32.mrb[28].mxu1 }
 0x277   : > { %v1298_v44 = vpop.f32.mrb[29].mxu1 }
 0x278   : > { %1061 = vst [vmem:[%s2075_s28 + $0x68] sm:$0xff] %v1029_v42  ;;  %v1299_v45 = vadd.f32 %v1298_v44, %v1297_v27  ;;  %v1300_v48 = vpop.f32.mrb[30].mxu1 }
 0x279   : > { %v1301_v28 = vpop.f32.mrb[31].mxu1 }
 0x27a   : > { %v946_v51 = vadd.f32 %v1299_v45, %v2068_v63  ;;  %v1302_v54 = vadd.f32 %v1301_v28, %v1300_v48 }
 0x27c   : > { %v1030_v57 = vadd.f32 %v946_v51, %v1915_v49  ;;  %v949_v46 = vadd.f32 %v1302_v54, %v2068_v63 }
 0x27e   : > { %1062 = vst [vmem:[%s2075_s28 + $0x70] sm:$0xff] %v1030_v57  ;;  %v1031_v60 = vadd.f32 %v949_v46, %v1918_v50  ;;  %v1303_v25 = vpop.f32.mrb[32].mxu1 }
 0x27f   : > { %v1304_v47 = vpop.f32.mrb[33].mxu1 }
 0x280   : > { %1063 = vst [vmem:[%s2075_s28 + $0x78] sm:$0xff] %v1031_v60  ;;  %v1305_v1 = vadd.f32 %v1304_v47, %v1303_v25  ;;  %v1306_v34 = vpop.f32.mrb[34].mxu1 }
 0x281   : > { %v1307_v2 = vpop.f32.mrb[35].mxu1 }
 0x282   : > { %v954_v3 = vadd.f32 %v1305_v1, %v2068_v63  ;;  %v1308_v35 = vadd.f32 %v1307_v2, %v1306_v34 }
 0x284   : > { %v1032_v26 = vadd.f32 %v954_v3, %v1924_v52  ;;  %v957_v49 = vadd.f32 %v1308_v35, %v2068_v63 }
 0x286   : > { %1064 = vst [vmem:[%s2075_s28 + $0x80] sm:$0xff] %v1032_v26  ;;  %v1033_v4 = vadd.f32 %v957_v49, %v1927_v53  ;;  %v1309_v7 = vpop.f32.mrb[36].mxu1 }
 0x287   : > { %v1310_v50 = vpop.f32.mrb[37].mxu1 }
 0x288   : > { %1065 = vst [vmem:[%s2075_s28 + $0x88] sm:$0xff] %v1033_v4  ;;  %v1311_v8 = vadd.f32 %v1310_v50, %v1309_v7  ;;  %v1312_v11 = vpop.f32.mrb[38].mxu1 }
 0x289   : > { %v1313_v14 = vpop.f32.mrb[39].mxu1 }
 0x28a   : > { %v962_v37 = vadd.f32 %v1311_v8, %v2068_v63  ;;  %v1314_v17 = vadd.f32 %v1313_v14, %v1312_v11 }
 0x28c   : > { %v1034_v18 = vadd.f32 %v962_v37, %v1933_v55  ;;  %v965_v52 = vadd.f32 %v1314_v17, %v2068_v63 }
 0x28e   : > { %1066 = vst [vmem:[%s2075_s28 + $0x90] sm:$0xff] %v1034_v18  ;;  %v1035_v38 = vadd.f32 %v965_v52, %v1936_v56  ;;  %v1315_v19 = vpop.f32.mrb[40].mxu1 }
 0x28f   : > { %v1316_v53 = vpop.f32.mrb[41].mxu1 }
 0x290   : > { %1067 = vst [vmem:[%s2075_s28 + $0x98] sm:$0xff] %v1035_v38  ;;  %v1317_v22 = vadd.f32 %v1316_v53, %v1315_v19  ;;  %v1318_v20 = vpop.f32.mrb[42].mxu1 }
 0x291   : > { %v1319_v23 = vpop.f32.mrb[43].mxu1 }
 0x292   : > { %v970_v24 = vadd.f32 %v1317_v22, %v2068_v63  ;;  %v1320_v0 = vadd.f32 %v1319_v23, %v1318_v20 }
 0x294   : > { %v1036_v40 = vadd.f32 %v970_v24, %v1942_v58  ;;  %v973_v55 = vadd.f32 %v1320_v0, %v2068_v63 }
 0x296   : > { %1068 = vst [vmem:[%s2075_s28 + $0xa0] sm:$0xff] %v1036_v40  ;;  %v1037_v29 = vadd.f32 %v973_v55, %v1945_v59  ;;  %v1321_v30 = vpop.f32.mrb[44].mxu1 }
 0x297   : > { %v1322_v56 = vpop.f32.mrb[45].mxu1 }
 0x298   : > { %1069 = vst [vmem:[%s2075_s28 + $0xa8] sm:$0xff] %v1037_v29  ;;  %v1323_v41 = vadd.f32 %v1322_v56, %v1321_v30  ;;  %v1324_v21 = vpop.f32.mrb[46].mxu1 }
 0x299   : > { %v1325_v31 = vpop.f32.mrb[47].mxu1 }
 0x29a   : > { %v978_v32 = vadd.f32 %v1323_v41, %v2068_v63  ;;  %v1326_v33 = vadd.f32 %v1325_v31, %v1324_v21 }
 0x29c   : > { %v1038_v36 = vadd.f32 %v978_v32, %v1951_v61  ;;  %v981_v58 = vadd.f32 %v1326_v33, %v2068_v63 }
 0x29e   : > { %1070 = vst [vmem:[%s2075_s28 + $0xb0] sm:$0xff] %v1038_v36  ;;  %v1039_v39 = vadd.f32 %v981_v58, %v1954_v62  ;;  %v1327_v43 = vpop.f32.mrb[48].mxu1 }
 0x29f   : > { %v1328_v59 = vpop.f32.mrb[49].mxu1 }
 0x2a0   : > { %1071 = vst [vmem:[%s2075_s28 + $0xb8] sm:$0xff] %v1039_v39  ;;  %v1329_v42 = vadd.f32 %v1328_v59, %v1327_v43  ;;  %v1330_v27 = vpop.f32.mrb[50].mxu1 }
 0x2a1   : > { %v1331_v44 = vpop.f32.mrb[51].mxu1 }
 0x2a2   : > { %v986_v45 = vadd.f32 %v1329_v42, %v2068_v63  ;;  %v1332_v48 = vadd.f32 %v1331_v44, %v1330_v27 }
 0x2a4   : > { %v1040_v28 = vadd.f32 %v986_v45, %v1960_v5  ;;  %v989_v61 = vadd.f32 %v1332_v48, %v2068_v63 }
 0x2a6   : > { %1072 = vst [vmem:[%s2075_s28 + $0xc0] sm:$0xff] %v1040_v28  ;;  %v1041_v51 = vadd.f32 %v989_v61, %v1963_v6  ;;  %v1333_v54 = vpop.f32.mrb[52].mxu1 }
 0x2a7   : > { %v1334_v62 = vpop.f32.mrb[53].mxu1 }
 0x2a8   : > { %1073 = vst [vmem:[%s2075_s28 + $0xc8] sm:$0xff] %v1041_v51  ;;  %v1335_v57 = vadd.f32 %v1334_v62, %v1333_v54  ;;  %v1336_v46 = vpop.f32.mrb[54].mxu1 }
 0x2a9   : > { %v1337_v60 = vpop.f32.mrb[55].mxu1 }
 0x2aa   : > { %v994_v25 = vadd.f32 %v1335_v57, %v2068_v63  ;;  %v1338_v47 = vadd.f32 %v1337_v60, %v1336_v46 }
 0x2ac   : > { %v1042_v1 = vadd.f32 %v994_v25, %v1969_v9  ;;  %v997_v5 = vadd.f32 %v1338_v47, %v2068_v63 }
 0x2ae   : > { %1074 = vst [vmem:[%s2075_s28 + $0xd0] sm:$0xff] %v1042_v1  ;;  %v1043_v34 = vadd.f32 %v997_v5, %v1972_v10  ;;  %v1339_v2 = vpop.f32.mrb[56].mxu1 }
 0x2af   : > { %v1340_v6 = vpop.f32.mrb[57].mxu1 }
 0x2b0   : > { %1075 = vst [vmem:[%s2075_s28 + $0xd8] sm:$0xff] %v1043_v34  ;;  %v1341_v3 = vadd.f32 %v1340_v6, %v1339_v2  ;;  %v1342_v35 = vpop.f32.mrb[58].mxu1 }
 0x2b1   : > { %v1343_v26 = vpop.f32.mrb[59].mxu1 }
 0x2b2   : > { %v1002_v49 = vadd.f32 %v1341_v3, %v2068_v63  ;;  %v1344_v4 = vadd.f32 %v1343_v26, %v1342_v35 }
 0x2b4   : > { %v1044_v7 = vadd.f32 %v1002_v49, %v1978_v12  ;;  %v1005_v9 = vadd.f32 %v1344_v4, %v2068_v63 }
 0x2b6   : > { %1076 = vst [vmem:[%s2075_s28 + $0xe0] sm:$0xff] %v1044_v7  ;;  %v1045_v50 = vadd.f32 %v1005_v9, %v1981_v13  ;;  %v1345_v10 = vpop.f32.mrb[60].mxu1 }
 0x2b7   : > { %v1346_v8 = vpop.f32.mrb[61].mxu1 }
 0x2b8   : > { %1077 = vst [vmem:[%s2075_s28 + $0xe8] sm:$0xff] %v1045_v50  ;;  %v1347_v11 = vadd.f32 %v1346_v8, %v1345_v10  ;;  %v1348_v14 = vpop.f32.mrb[62].mxu1 }
 0x2b9   : > { %v1349_v37 = vpop.f32.mrb[63].mxu1 }
 0x2ba   : > { %v1010_v17 = vadd.f32 %v1347_v11, %v2068_v63  ;;  %v1350_v18 = vadd.f32 %v1349_v37, %v1348_v14 }
 0x2bc   : > { %v1046_v12 = vadd.f32 %v1010_v17, %v1987_v15  ;;  %v1013_v52 = vadd.f32 %v1350_v18, %v2068_v63 }
 0x2be   : > { %1078 = vst [vmem:[%s2075_s28 + $0xf0] sm:$0xff] %v1046_v12  ;;  %v1047_v13 = vadd.f32 %v1013_v52, %v1990_v16 }
 0x2c0   : > { %1079 = vst [vmem:[%s2075_s28 + $0xf8] sm:$0xff] %v1047_v13 }
 0x2c1   : > { %1564 = shalt.err (!%p1561_p7)
}
 0x2c2   : > { %s1565_s14 = scalar_lea.hbm %s2172_s12, 4096  ;;  %s1569_s15 = scalar_lea.hbm %s2225_s5, 16384 }
 0x2c3   : > { %p1566_p9 = scmp.ne.s32.totalorder %s2172_s12, %s1565_s14  ;;  %p1570_p5 = scmp.lt.u32.totalorder %s2172_s12, %s2225_s5 }
 0x2c4   : > { %p1571_p10 = scmp.lt.u32.totalorder %s1569_s15, %s1565_s14  ;;  %p1573_p2 = scmp.lt.u32.totalorder %s1565_s14, %s2172_s12 }
 0x2c5   : > { %p1567_p12 = pnand %p1566_p9, %p1782_p8 }
 0x2c6   : > { %p1572_p1 = por %p1571_p10, %p1570_p5 }
 0x2c7   : > { %p1568_p0 = pneg %p1567_p12 }
 0x2c8   : > { %p1574_p4 = por %p1573_p2, %p1572_p1 }
 0x2ca   : > { %p1575_p6 = pnand %p1574_p4, %p1568_p0 }
 0x2cc   : > { %1578 = shalt.err (!%p1575_p6)
}
 0x2cd   : > { %s1632_s13 = smov 128   ;;  %s1633_s11 = smov 8  }
 0x2ce   : > { %1361 = dma.vmem_to_hbm [thread:$0]  (%p1782_p8), %s2174_s17, 4096, %s2172_s12, %s1081_s22, %s1632_s13, %s1632_s13, %s1633_s11  }
 0x2cf PF: > { %p1383_p11 = scmp.ge.s32.totalorder %s1621_s21, 2  ;;  %s1109_s29 = sand.u32 1, %s1609_s18  }
 0x2d0   : > { %p2240_p13 = scmp.ne.s32.totalorder %s2230_s25, 0  ;;  %s1110_s30 = scalar_lea.sflag [#allocation4], %s1109_s29 }
 0x2d2   : > { %p1375_p3 = pnand %p1383_p11, %p2240_p13 }
 0x2d4   : > { %1604 = dma.done.wait (!%p1375_p3), %s1110_s30, 4096  }
 0x2d5   : > { %1606 = vsyncadd (!%p1375_p3), %s1110_s30, 4294963200  ;;  %p19_p7 = scmp.ge.s32.totalorder %s1769_s23, 6   ;;  %s2241_s18 = smov %s1613_s19 }
 0x2d6   : > { %s2242_s19 = smov %s1617_s20  ;;  %s2243_s20 = smov %s1778_s7 }
 0x2d7   : > { %s2244_s21 = smov %s1769_s23  ;;  %21 = sbr.rel (!%p19_p7) target bundleno = 6 (0x6), region = 93 }
 0x2de   :  { %1115 = vsyncpa [#allocation3], 1 }
 0x2df   :  { %1117 = vsyncpa [#allocation3 + $0x1], 1 }
 0x2e0   :  { %1118 = vsyncpa [#allocation6], 1 }
 0x2e1   :  { %1119 = vsyncpa [#allocation4], 1 }
 0x2e2   :  { %1121 = vsyncpa [#allocation4 + $0x1], 1 }

</bundles_post_ra>
